<compile_context>
chip_gen: v7x
topology: tpu7x:2x2x1
jax: 0.10.0
libtpu: 0.0.40
codegen_flags: <defaults>
</compile_context>

<pallas_src>
import jax
import jax.numpy as jnp
from jax.experimental import pallas as pl
from jax.experimental.pallas import tpu as pltpu


def gammanet_kernel(xt_ref, w1_ref, b1_ref, w2_ref, b2_ref, w3_ref, b3_ref,
                    wg_ref, bg_ref, out_ref):
    # Feature-major forward ("batch in lanes"):
    #   xt : [2*in_dims, TB]   concat of the two states, transposed
    #   wN : [outN, inN]       PyTorch layout -> h^T = W @ x^T + b
    #   bN : [outN, 1]         broadcast across the lane (batch) axis
    h1 = jnp.maximum(
        jnp.dot(w1_ref[...], xt_ref[...], preferred_element_type=jnp.float32)
        + b1_ref[...], 0.0)                                      # [F1, TB]
    h2 = jnp.maximum(
        jnp.dot(w2_ref[...], h1, preferred_element_type=jnp.float32)
        + b2_ref[...], 0.0)                                      # [F2, TB]
    h3 = jnp.maximum(
        jnp.dot(w3_ref[...], h2, preferred_element_type=jnp.float32)
        + b3_ref[...], 0.0)                                      # [F3, TB]
    # Gam (Linear(F3 -> 1)): broadcast multiply + sublane reduce (XLU slot)
    # instead of a 1-tall MXU push; bias is an SMEM scalar (scalar-slot add).
    gam = jnp.sum(h3 * wg_ref[...], axis=0, keepdims=True) + bg_ref[0, 0]
    out_ref[...] = gam                                           # [1, TB] lane-dense


def _round_up(x, m):
    return ((x + m - 1) // m) * m


def gammanet_forward(state_1, state_2, params, *, block_b=256):
    """Fused GammaNet forward.

    params = (w1, b1, w2, b2, w3, b3, wg_col, bg)
      wN:      [outN, inN]   (PyTorch nn.Linear layout)
      bN:      [outN, 1]
      wg_col:  [fc3_dims, 1] (Gam weight as a column for the VPU reduction)
      bg:      [1, 1]        (Gam bias; lives in SMEM)
    Returns gam of shape (B, 1).
    """
    w1, b1, w2, b2, w3, b3, wg_col, bg = params
    B, in_dims = state_1.shape
    two_in = 2 * in_dims
    fc1, fc2, fc3 = w1.shape[0], w2.shape[0], w3.shape[0]

    # Fuse the concat once in the wrapper and go feature-major: [2*in_dims, B].
    xt = jnp.concatenate([state_1.T, state_2.T], axis=0)

    # Batch lives on the lane axis -> tile must be a multiple of 128.
    tb = min(_round_up(block_b, 128), _round_up(B, 128))
    padded_b = _round_up(B, tb)
    if padded_b != B:
        xt = jnp.pad(xt, ((0, 0), (0, padded_b - B)))
    grid = (padded_b // tb,)

    # Advisory cost estimate (matmul FLOPs + total bytes moved).
    flops = 2 * padded_b * (two_in * fc1 + fc1 * fc2 + fc2 * fc3 + fc3)
    param_bytes = sum(int(p.size) * p.dtype.itemsize for p in params)
    bytes_accessed = (padded_b * two_in + padded_b) * 4 + param_bytes

    def resident(arr):
        # Same block every grid step -> stays resident in VMEM.
        return pl.BlockSpec(arr.shape, lambda i: (0, 0))

    out = pl.pallas_call(
        gammanet_kernel,
        out_shape=jax.ShapeDtypeStruct((1, padded_b), jnp.float32),
        grid=grid,
        in_specs=[
            pl.BlockSpec((two_in, tb), lambda i: (0, i)),        # x^T, streamed
            resident(w1), resident(b1),
            resident(w2), resident(b2),
            resident(w3), resident(b3),
            resident(wg_col),
            pl.BlockSpec(memory_space=pltpu.MemorySpace.SMEM),   # bg scalar
        ],
        out_specs=pl.BlockSpec((1, tb), lambda i: (0, i)),       # lane-dense row
        compiler_params=pltpu.CompilerParams(
            dimension_semantics=("parallel",)),                  # megacore on v7x
        cost_estimate=pl.CostEstimate(
            flops=flops, transcendentals=0, bytes_accessed=bytes_accessed),
    )(xt, w1, b1, w2, b2, w3, b3, wg_col, bg)

    # Slice off padded batch columns (they carry relu(bias) garbage) and go
    # back to the module's (B, 1) orientation.
    return out[:, :B].T


def init_linear(key, fan_in, fan_out):
    """Matches nn.Linear's default U(-1/sqrt(fan_in), 1/sqrt(fan_in)).
    Weight stored [fan_out, fan_in] (PyTorch layout); bias as a [fan_out, 1]
    column for the in-kernel lane broadcast."""
    kw, kb = jax.random.split(key)
    bound = 1.0 / jnp.sqrt(fan_in)
    w = jax.random.uniform(kw, (fan_out, fan_in), jnp.float32, -bound, bound)
    b = jax.random.uniform(kb, (fan_out, 1), jnp.float32, -bound, bound)
    return w, b


if __name__ == "__main__":
    # Small, module-consistent sizes: feature widths all <=64, batch sized so
    # the grid has 2 steps at TB=256 (exercises pipelining + v7x megacore).
    batch = 512
    input_dims = 16          # per-state feature size; fc1 sees input_dims * 2
    fc1_dims = 64
    fc2_dims = 32
    fc3_dims = 32            # must equal fc2_dims for the reference forward to be valid
    assert fc2_dims == fc3_dims, "GammaNet.forward requires fc2_dims == fc3_dims"

    key = jax.random.PRNGKey(0)
    k1, k2, k3, kg, ks1, ks2 = jax.random.split(key, 6)

    w1, b1 = init_linear(k1, input_dims * 2, fc1_dims)   # fc1 (on the concatenated input)
    w2, b2 = init_linear(k2, fc1_dims, fc2_dims)         # fc2
    w3, b3 = init_linear(k3, fc2_dims, fc3_dims)         # fc3
    wg, bg = init_linear(kg, fc2_dims, 1)                # Gam = Linear(fc2_dims, 1)

    # Gam weight as a [fc3, 1] column for the VPU multiply + sublane reduction.
    wg_col = wg.reshape(fc3_dims, 1)
    params = (w1, b1, w2, b2, w3, b3, wg_col, bg)

    state_1 = jax.random.normal(ks1, (batch, input_dims), jnp.float32)
    state_2 = jax.random.normal(ks2, (batch, input_dims), jnp.float32)

    gam = gammanet_forward(state_1, state_2, params)
    jax.block_until_ready(gam)

    # Sanity check against a pure-JAX reference of the same forward pass.
    x = jnp.concatenate([state_1, state_2], axis=1)
    h = jnp.maximum(x @ w1.T + b1.T, 0.0)
    h = jnp.maximum(h @ w2.T + b2.T, 0.0)
    h = jnp.maximum(h @ w3.T + b3.T, 0.0)
    ref = h @ wg.T + bg.T
    assert gam.shape == (batch, 1)
    assert jnp.allclose(gam, ref, atol=1e-4, rtol=1e-4)

    print("KERNEL_OK")
</pallas_src>

<mosaic_0001>
module attributes {stable_mosaic.version = 11 : i64} {
  func.func @gammanet_kernel(%arg0: i32, %arg1: memref<32x256xf32, #tpu.memory_space<vmem>>, %arg2: memref<64x32xf32, #tpu.memory_space<vmem>>, %arg3: memref<64x1xf32, #tpu.memory_space<vmem>>, %arg4: memref<32x64xf32, #tpu.memory_space<vmem>>, %arg5: memref<32x1xf32, #tpu.memory_space<vmem>>, %arg6: memref<32x32xf32, #tpu.memory_space<vmem>>, %arg7: memref<32x1xf32, #tpu.memory_space<vmem>>, %arg8: memref<32x1xf32, #tpu.memory_space<vmem>>, %arg9: memref<1x1xf32, #tpu.memory_space<smem>>, %arg10: memref<1x256xf32, #tpu.memory_space<vmem>>) attributes {dimension_semantics = [#tpu.dimension_semantics<parallel>], iteration_bounds = array<i64: 2>, scalar_prefetch = 0 : i64, scratch_operands = 0 : i64, tpu.core_type = #tpu.core_type<tc>, window_params = [{transform_indices = @transform_0, window_bounds = array<i64: 32, 256>}, {pipeline_mode = #tpu.pipeline_mode<synchronous>, transform_indices = @transform_1, window_bounds = array<i64: 64, 32>}, {pipeline_mode = #tpu.pipeline_mode<synchronous>, transform_indices = @transform_2, window_bounds = array<i64: 64, 1>}, {pipeline_mode = #tpu.pipeline_mode<synchronous>, transform_indices = @transform_3, window_bounds = array<i64: 32, 64>}, {pipeline_mode = #tpu.pipeline_mode<synchronous>, transform_indices = @transform_4, window_bounds = array<i64: 32, 1>}, {pipeline_mode = #tpu.pipeline_mode<synchronous>, transform_indices = @transform_5, window_bounds = array<i64: 32, 32>}, {pipeline_mode = #tpu.pipeline_mode<synchronous>, transform_indices = @transform_6, window_bounds = array<i64: 32, 1>}, {pipeline_mode = #tpu.pipeline_mode<synchronous>, transform_indices = @transform_7, window_bounds = array<i64: 32, 1>}, {transform_indices = @transform_8, window_bounds = array<i64: 1, 1>}, {transform_indices = @transform_9, window_bounds = array<i64: 1, 256>}]} {
    %c0 = arith.constant 0 : index
    %c0_0 = arith.constant 0 : index
    %0 = vector.load %arg2[%c0, %c0_0] : memref<64x32xf32, #tpu.memory_space<vmem>>, vector<64x32xf32>
    %c0_1 = arith.constant 0 : index
    %c0_2 = arith.constant 0 : index
    %1 = vector.load %arg1[%c0_1, %c0_2] : memref<32x256xf32, #tpu.memory_space<vmem>>, vector<32x256xf32>
    %cst = arith.constant dense<0.000000e+00> : vector<64x256xf32>
    %2 = tpu.matmul %0, %1, %cst {dimension_numbers = #tpu.dot_dimension_numbers<[1], [0], [0], [1], [0, 0, 1, 1], [], []>} : vector<64x32xf32>, vector<32x256xf32>, vector<64x256xf32> -> vector<64x256xf32>
    %c0_3 = arith.constant 0 : index
    %c0_4 = arith.constant 0 : index
    %3 = vector.load %arg3[%c0_3, %c0_4] : memref<64x1xf32, #tpu.memory_space<vmem>>, vector<64x1xf32>
    %4 = vector.broadcast %3 : vector<64x1xf32> to vector<64x256xf32>
    %5 = arith.addf %2, %4 : vector<64x256xf32>
    %cst_5 = arith.constant 0.000000e+00 : f32
    %6 = vector.broadcast %cst_5 : f32 to vector<64x256xf32>
    %7 = arith.maximumf %5, %6 : vector<64x256xf32>
    %c0_6 = arith.constant 0 : index
    %c0_7 = arith.constant 0 : index
    %8 = vector.load %arg4[%c0_6, %c0_7] : memref<32x64xf32, #tpu.memory_space<vmem>>, vector<32x64xf32>
    %cst_8 = arith.constant dense<0.000000e+00> : vector<32x256xf32>
    %9 = tpu.matmul %8, %7, %cst_8 {dimension_numbers = #tpu.dot_dimension_numbers<[1], [0], [0], [1], [0, 0, 1, 1], [], []>} : vector<32x64xf32>, vector<64x256xf32>, vector<32x256xf32> -> vector<32x256xf32>
    %c0_9 = arith.constant 0 : index
    %c0_10 = arith.constant 0 : index
    %10 = vector.load %arg5[%c0_9, %c0_10] : memref<32x1xf32, #tpu.memory_space<vmem>>, vector<32x1xf32>
    %11 = vector.broadcast %10 : vector<32x1xf32> to vector<32x256xf32>
    %12 = arith.addf %9, %11 : vector<32x256xf32>
    %cst_11 = arith.constant 0.000000e+00 : f32
    %13 = vector.broadcast %cst_11 : f32 to vector<32x256xf32>
    %14 = arith.maximumf %12, %13 : vector<32x256xf32>
    %c0_12 = arith.constant 0 : index
    %c0_13 = arith.constant 0 : index
    %15 = vector.load %arg6[%c0_12, %c0_13] : memref<32x32xf32, #tpu.memory_space<vmem>>, vector<32x32xf32>
    %cst_14 = arith.constant dense<0.000000e+00> : vector<32x256xf32>
    %16 = tpu.matmul %15, %14, %cst_14 {dimension_numbers = #tpu.dot_dimension_numbers<[1], [0], [0], [1], [0, 0, 1, 1], [], []>} : vector<32x32xf32>, vector<32x256xf32>, vector<32x256xf32> -> vector<32x256xf32>
    %c0_15 = arith.constant 0 : index
    %c0_16 = arith.constant 0 : index
    %17 = vector.load %arg7[%c0_15, %c0_16] : memref<32x1xf32, #tpu.memory_space<vmem>>, vector<32x1xf32>
    %18 = vector.broadcast %17 : vector<32x1xf32> to vector<32x256xf32>
    %19 = arith.addf %16, %18 : vector<32x256xf32>
    %cst_17 = arith.constant 0.000000e+00 : f32
    %20 = vector.broadcast %cst_17 : f32 to vector<32x256xf32>
    %21 = arith.maximumf %19, %20 : vector<32x256xf32>
    %c0_18 = arith.constant 0 : index
    %c0_19 = arith.constant 0 : index
    %22 = vector.load %arg8[%c0_18, %c0_19] : memref<32x1xf32, #tpu.memory_space<vmem>>, vector<32x1xf32>
    %23 = vector.broadcast %22 : vector<32x1xf32> to vector<32x256xf32>
    %24 = arith.mulf %21, %23 : vector<32x256xf32>
    %cst_20 = arith.constant dense<0.000000e+00> : vector<256xf32>
    %25 = vector.multi_reduction <add>, %24, %cst_20 [0] : vector<32x256xf32> to vector<256xf32>
    %26 = vector.shape_cast %25 : vector<256xf32> to vector<1x256xf32>
    %c0_21 = arith.constant 0 : index
    %c0_22 = arith.constant 0 : index
    %27 = memref.load %arg9[%c0_21, %c0_22] : memref<1x1xf32, #tpu.memory_space<smem>>
    %28 = vector.broadcast %27 : f32 to vector<1x256xf32>
    %29 = arith.addf %26, %28 : vector<1x256xf32>
    %c0_23 = arith.constant 0 : index
    %c0_24 = arith.constant 0 : index
    %30 = vector.load %arg10[%c0_23, %c0_24] : memref<1x256xf32, #tpu.memory_space<vmem>>, vector<1x256xf32>
    tpu.vector_store %arg10[%c0_23, %c0_24], %29 {strides = array<i32>} : memref<1x256xf32, #tpu.memory_space<vmem>>, vector<1x256xf32>,
    return
  }
  func.func @transform_0(%arg0: i32) -> (i32, i32) {
    %c0_i32 = arith.constant 0 : i32
    %c0_i32_0 = arith.constant 0 : i32
    return %c0_i32, %arg0 : i32, i32
  }
  func.func @transform_1(%arg0: i32) -> (i32, i32) {
    %c0_i32 = arith.constant 0 : i32
    %c0_i32_0 = arith.constant 0 : i32
    %c0_i32_1 = arith.constant 0 : i32
    return %c0_i32, %c0_i32_0 : i32, i32
  }
  func.func @transform_2(%arg0: i32) -> (i32, i32) {
    %c0_i32 = arith.constant 0 : i32
    %c0_i32_0 = arith.constant 0 : i32
    %c0_i32_1 = arith.constant 0 : i32
    return %c0_i32, %c0_i32_0 : i32, i32
  }
  func.func @transform_3(%arg0: i32) -> (i32, i32) {
    %c0_i32 = arith.constant 0 : i32
    %c0_i32_0 = arith.constant 0 : i32
    %c0_i32_1 = arith.constant 0 : i32
    return %c0_i32, %c0_i32_0 : i32, i32
  }
  func.func @transform_4(%arg0: i32) -> (i32, i32) {
    %c0_i32 = arith.constant 0 : i32
    %c0_i32_0 = arith.constant 0 : i32
    %c0_i32_1 = arith.constant 0 : i32
    return %c0_i32, %c0_i32_0 : i32, i32
  }
  func.func @transform_5(%arg0: i32) -> (i32, i32) {
    %c0_i32 = arith.constant 0 : i32
    %c0_i32_0 = arith.constant 0 : i32
    %c0_i32_1 = arith.constant 0 : i32
    return %c0_i32, %c0_i32_0 : i32, i32
  }
  func.func @transform_6(%arg0: i32) -> (i32, i32) {
    %c0_i32 = arith.constant 0 : i32
    %c0_i32_0 = arith.constant 0 : i32
    %c0_i32_1 = arith.constant 0 : i32
    return %c0_i32, %c0_i32_0 : i32, i32
  }
  func.func @transform_7(%arg0: i32) -> (i32, i32) {
    %c0_i32 = arith.constant 0 : i32
    %c0_i32_0 = arith.constant 0 : i32
    %c0_i32_1 = arith.constant 0 : i32
    return %c0_i32, %c0_i32_0 : i32, i32
  }
  func.func @transform_8(%arg0: i32) -> (i32, i32) {
    %c0_i32 = arith.constant 0 : i32
    %c0_i32_0 = arith.constant 0 : i32
    %c0_i32_1 = arith.constant 0 : i32
    return %c0_i32, %c0_i32_0 : i32, i32
  }
  func.func @transform_9(%arg0: i32) -> (i32, i32) {
    %c0_i32 = arith.constant 0 : i32
    %c0_i32_0 = arith.constant 0 : i32
    return %c0_i32, %arg0 : i32, i32
  }
}

</mosaic_0001>

<bundles_post_ra>
// kernel: tpu_custom_call.1
= control target key start
LH: loop header
LB: loop body
LE: loop exit
PB: predicated region body
PF: predicated region fallthrough
CT: control target
= control target key end

     0   :  { %s1501_s0 = inlined_call_operand.vmem [shape: f32[32,512], index: 0, kind: input, shape index: {}]   ;;  %s1502_s1 = inlined_call_operand.vmem [shape: f32[64,32], index: 1, kind: input, shape index: {}]   ;;  %s1503_s2 = inlined_call_operand.vmem [shape: f32[64,1], index: 2, kind: input, shape index: {}]   ;;  %s1504_s3 = inlined_call_operand.vmem [shape: f32[32,64], index: 3, kind: input, shape index: {}]   ;;  %s1505_s4 = inlined_call_operand.vmem [shape: f32[32,1], index: 4, kind: input, shape index: {}]   ;;  %s1506_s5 = inlined_call_operand.vmem [shape: f32[32,32], index: 5, kind: input, shape index: {}]   ;;  %s1507_s6 = inlined_call_operand.vmem [shape: f32[32,1], index: 6, kind: input, shape index: {}]   ;;  %s1508_s7 = inlined_call_operand.vmem [shape: f32[32,1], index: 7, kind: input, shape index: {}]   ;;  %s1509_s8 = inlined_call_operand.<no memory space> [shape: f32[1,1], index: 8, kind: input, shape index: {}]   ;;  %s1510_s9 = inlined_call_operand.hbm [shape: f32[1,512], index: 9, kind: output, shape index: {}]  }
   0x1   :  { %14 = sst [smem:[#allocation2]] %s1509_s8 }
   0x2   :  { %15 = vsyncpa [#allocation5], 0 }
   0x3   :  { %17 = vsyncpa [#allocation5 + $0x1], 0  ;;  %s1255_s11 = smov 0   ;;  %s1257_s12 = smov 0  }
   0x4   :  { %s1259_s13 = smov 0   ;;  %s1261_s14 = smov 0  }
   0x5 LB: > { %s1017_s8 = sadd.s32 4294967295, %s1196_s14   ;;  %s1018_s15 = sadd.s32 4294967294, %s1196_s14   ;;  %s1196_s14 = sphi %s1261_s14, %s1516_s14   ;;  %s1192_s13 = sphi %s1259_s13, %s1515_s13   ;;  %s1188_s12 = sphi %s1257_s12, %s1514_s12   ;;  %s1184_s11 = sphi %s1255_s11, %s1513_s11  }
   0x6   : > { %s1278_s16 = sadd.s32 1, %s1196_s14   ;;  %s30_s17 = sadd.s32 1, %s1192_s13 }
   0x7   : > { %s27_s18 = ssub.s32 %s1196_s14, %s1278_s16  ;;  %p37_p0 = scmp.ne.s32.totalorder %s1192_s13, %s1188_s12 }
   0x8   : > { %p28_p1 = scmp.eq.s32.totalorder %s27_s18, 0  ;;  %p38_p2 = scmp.eq.s32.totalorder %s1196_s14, 0 }
   0x9   : > { %p235_p3 = scmp.eq.s32.totalorder %s1017_s8, 1  ;;  %p240_p4 = scmp.ne.s32.totalorder %s1188_s12, %s1184_s11 }
   0xa   : > { %s1291_s19 = scalar_select %p28_p1, %s1192_s13, %s30_s17  }
   0xb   : > { %p39_p5 = por %p38_p2, %p37_p0  ;;  %p1293_p6 = por %p235_p3, %p37_p0 }
   0xc   : > { %p241_p7 = scmp.eq.s32.totalorder %s1018_s15, 1  ;;  %p1020_p9 = scmp.ge.s32.totalorder %s1196_s14, 2 }
   0xe   : > { %p1297_p8 = por %p241_p7, %p240_p4  ;;  %281 = sbr.rel (%p1020_p9) target bundleno = 29 (0x1d), region = 48 }
  0x15   : > { %284 = sbr.rel (!%p39_p5) target bundleno = 29 (0x1d), region = 52  ;;  %s286_s22 = sand.u32 (%p39_p5), 1, %s1192_s13  }
  0x16   : > { %s1048_s23 = sshll.u32 (%p39_p5), %s1196_s14, 4  ;;  %s1021_s24 = sshll.u32 (%p39_p5), %s286_s22, 6 }
  0x17   : > { %s291_s27 = scalar_lea.vmem (%p39_p5), %s1501_s0, %s1048_s23  ;;  %s288_s28 = scalar_lea.vmem (%p39_p5), [#allocation3], %s1021_s24 }
  0x18   : > { %v304_v0 = vld [vmem:[%s291_s27] sm:$0xff] (%p39_p5)  ;;  %v306_v1 = vld [vmem:[%s291_s27 + $0x8] sm:$0xff] (%p39_p5) }
  0x19   : > { %v308_v2 = vld [vmem:[%s291_s27 + $0x20] sm:$0xff] (%p39_p5)  ;;  %305 = vst [vmem:[%s288_s28] sm:$0xff] (%p39_p5), %v304_v0  ;;  %307 = vst [vmem:[%s288_s28 + $0x8] sm:$0xff] (%p39_p5), %v306_v1  ;;  %v310_v3 = vld [vmem:[%s291_s27 + $0x28] sm:$0xff] (%p39_p5) }
  0x1a   : > { %309 = vst [vmem:[%s288_s28 + $0x10] sm:$0xff] (%p39_p5), %v308_v2  ;;  %v312_v4 = vld [vmem:[%s291_s27 + $0x40] sm:$0xff] (%p39_p5)  ;;  %v314_v5 = vld [vmem:[%s291_s27 + $0x48] sm:$0xff] (%p39_p5)  ;;  %311 = vst [vmem:[%s288_s28 + $0x18] sm:$0xff] (%p39_p5), %v310_v3 }
  0x1b   : > { %313 = vst [vmem:[%s288_s28 + $0x20] sm:$0xff] (%p39_p5), %v312_v4  ;;  %315 = vst [vmem:[%s288_s28 + $0x28] sm:$0xff] (%p39_p5), %v314_v5  ;;  %v316_v6 = vld [vmem:[%s291_s27 + $0x60] sm:$0xff] (%p39_p5)  ;;  %v318_v7 = vld [vmem:[%s291_s27 + $0x68] sm:$0xff] (%p39_p5) }
  0x1c   : > { %317 = vst [vmem:[%s288_s28 + $0x30] sm:$0xff] %v316_v6  ;;  %319 = vst [vmem:[%s288_s28 + $0x38] sm:$0xff] %v318_v7 }
  0x1d PF: > { %p1024_p10 = scmp.ge.s32.totalorder %s1196_s14, 1  ;;  %p324_p11 = scmp.lt.s32.totalorder %s1196_s14, 3 }
  0x1f   : > { %p325_p12 = pnand %p1024_p10, %p324_p11 }
  0x20   : > { %s1312_s29 = sand.u32 (!%p325_p12), 1, %s1188_s12   ;;  %v1198_v8 = vmov (!%p325_p12), 0.0   ;;  %v1199_v9 = vmov (!%p325_p12), 0   ;;  %v384_v10 = vld [vmem:[%s1503_s2] sm:$0xff] (!%p325_p12)  ;;  %v385_v22 = vld [vmem:[%s1503_s2 + $0x8] sm:$0xff] (!%p325_p12)  ;;  %v386_v23 = vld [vmem:[%s1503_s2 + $0x10] sm:$0xff] (!%p325_p12) }
  0x21   : > { %328 = sbr.rel (%p325_p12) target bundleno = 795 (0x31b), region = 75  ;;  %s1025_s30 = sshll.u32 (!%p325_p12), %s1312_s29, 6  ;;  %521 = vmatprep.mubr.f32.mxu0 (!%p325_p12), %v1198_v8  ;;  %697 = vmatprep.mubr.f32.mxu1 (!%p325_p12), %v1198_v8  ;;  %v388_v25 = vld [vmem:[%s1503_s2 + $0x20] sm:$0xff] (!%p325_p12)  ;;  %v387_v26 = vld [vmem:[%s1503_s2 + $0x18] sm:$0xff] (!%p325_p12)  ;;  %vm432_vm0 = vcmask (!%p325_p12), 261120   ;;  %v390_v28 = vld [vmem:[%s1503_s2 + $0x30] sm:$0xff] (!%p325_p12) }
  0x22   : > { %1132 = vset.pattern.permute.xlu0 (!%p325_p12), %v1199_v9  ;;  %1133 = vset.pattern.permute.xlu1 (!%p325_p12), %v1199_v9  ;;  %s333_s17 = scalar_lea.vmem (!%p325_p12), [#allocation3], %s1025_s30  ;;  %v368_v27 = vld [vmem:[%s1502_s1] sm:$0xff] (!%p325_p12)  ;;  %v389_v29 = vld [vmem:[%s1503_s2 + $0x28] sm:$0xff] (!%p325_p12)  ;;  %v391_v32 = vld [vmem:[%s1503_s2 + $0x38] sm:$0xff] (!%p325_p12)  ;;  %vm614_vm1 = vcmask (!%p325_p12), 523264   ;;  %s911_s15 = sld [smem:[#allocation2]] (!%p325_p12) }
  0x23   : > { %v377_v11 = vld [vmem:[%s333_s17 + $0x8] sm:$0xff] (!%p325_p12)  ;;  %v379_v12 = vld [vmem:[%s333_s17 + $0x18] sm:$0xff] (!%p325_p12)  ;;  %v376_v13 = vld [vmem:[%s333_s17] sm:$0xff] (!%p325_p12)  ;;  %394 = vperm.xlu0 (!%p325_p12), %1132, %v384_v10   ;;  %404 = vperm.xlu1 (!%p325_p12), %1133, %v386_v23   ;;  %s1049_s18 = sshll.u32 (!%p325_p12), %s1017_s8, 5  ;;  %s939_s27 = scalar_lea.sflag (!%p325_p12), [#allocation5], %s1312_s29 }
  0x24   : > { %v1050_v14 = vpack.c.bf16 (!%p325_p12), %v379_v12, %v377_v11  ;;  %v378_v15 = vld [vmem:[%s333_s17 + $0x10] sm:$0xff] (!%p325_p12)  ;;  %v381_v16 = vld [vmem:[%s333_s17 + $0x28] sm:$0xff] (!%p325_p12)  ;;  %v383_v17 = vld [vmem:[%s333_s17 + $0x38] sm:$0xff] (!%p325_p12)  ;;  %s1457_s26 = scalar_lea.hbm (!%p325_p12), %s1510_s9, %s1049_s18  ;;  %s1201_s8 = smov (!%p325_p12), [#allocation4]  }
  0x25   : > { %v1052_v18 = vpack.c.bf16 (!%p325_p12), %v378_v15, %v376_v13  ;;  %v1054_v19 = vpack.c.bf16 (!%p325_p12), %v383_v17, %v381_v16  ;;  %v380_v20 = vld [vmem:[%s333_s17 + $0x20] sm:$0xff] (!%p325_p12)  ;;  %v382_v21 = vld [vmem:[%s333_s17 + $0x30] sm:$0xff] (!%p325_p12)  ;;  %v369_v30 = vld [vmem:[%s1502_s1 + $0x8] sm:$0xff] (!%p325_p12)  ;;  %s1026_s17 = sshll.u32 (!%p325_p12), %s1312_s29, 1  ;;  %s1138_s30 = sshll.u32 (!%p325_p12), %s1201_s8, 4  ;;  %s1139_s30 = int_to_ptr.vmem [resolvable:$false] %s1138_s30 }
  0x26   : > { %1051 = vmatprep.subr.bf16.mxu0 (!%p325_p12), %v1050_v14  ;;  %v1056_v24 = vpack.c.bf16 (!%p325_p12), %v382_v21, %v380_v20  ;;  %v590_v31 = vld [vmem:[%s1505_s4] sm:$0xff] (!%p325_p12)  ;;  %v370_v33 = vld [vmem:[%s1502_s1 + $0x10] sm:$0xff] (!%p325_p12)  ;;  %v591_v35 = vld [vmem:[%s1505_s4 + $0x8] sm:$0xff] (!%p325_p12)  ;;  %s365_s22 = scalar_lea.vmem (!%p325_p12), [#allocation4], %s1026_s17  ;;  %s1140_s10 = scalar_lea.vmem (!%p325_p12), %s1139_s30, 64 }
  0x27   : > { %1053 = vmatpush1.bf16.msra.mxu0 (!%p325_p12), %v1052_v18  ;;  %399 = vperm.xlu0 (!%p325_p12), %1132, %v385_v22   ;;  %v592_v34 = vld [vmem:[%s1505_s4 + $0x10] sm:$0xff] (!%p325_p12)  ;;  %v371_v36 = vld [vmem:[%s1502_s1 + $0x18] sm:$0xff] (!%p325_p12)  ;;  %v728_v37 = vld [vmem:[%s1507_s6] sm:$0xff] (!%p325_p12)  ;;  %s953_s23 = sshll.u32 (!%p325_p12), %s365_s22, 4  ;;  %s1459_s23 = int_to_ptr.vmem [resolvable:$true] %s953_s23 }
  0x28   : > { %1055 = vmatprep.subr.bf16.mxu0 %v1054_v19  ;;  %409 = vperm.xlu1 %1133, %v387_v26   ;;  %v593_v38 = vld [vmem:[%s1505_s4 + $0x18] sm:$0xff]  ;;  %v372_v39 = vld [vmem:[%s1502_s1 + $0x20] sm:$0xff]  ;;  %v730_v40 = vld [vmem:[%s1507_s6 + $0x10] sm:$0xff]  ;;  %s1134_s28 = scalar_lea.vmem %s1459_s23, 32  ;;  %p1141_p2 = scmp.lt.s32.totalorder %s1459_s23, %s1139_s30 }
  0x29   : > { %v729_v41 = vld [vmem:[%s1507_s6 + $0x8] sm:$0xff]  ;;  %v861_v43 = vld [vmem:[%s1508_s7] sm:$0xff]  ;;  %v731_v44 = vld [vmem:[%s1507_s6 + $0x18] sm:$0xff]  ;;  %p1135_p13 = scmp.ne.s32.totalorder %s1459_s23, %s1134_s28  ;;  %p1142_p3 = scmp.lt.s32.totalorder %s1140_s10, %s1134_s28 }
  0x2a   : > { %v373_v42 = vld [vmem:[%s1502_s1 + $0x28] sm:$0xff]  ;;  %v374_v45 = vld [vmem:[%s1502_s1 + $0x30] sm:$0xff]  ;;  %v375_v48 = vld [vmem:[%s1502_s1 + $0x38] sm:$0xff] }
  0x2b   : > { %1057 = vmatpush1.bf16.msra.mxu0 %v1056_v24  ;;  %414 = vperm.xlu0 %1132, %v388_v25   ;;  %v863_v46 = vld [vmem:[%s1508_s7 + $0x10] sm:$0xff]  ;;  %v862_v47 = vld [vmem:[%s1508_s7 + $0x8] sm:$0xff]  ;;  %v864_v49 = vld [vmem:[%s1508_s7 + $0x18] sm:$0xff]  ;;  %p1136_p0 = pnand %p1135_p13, %p1293_p6  ;;  %p1143_p4 = por %p1142_p3, %p1141_p2 }
  0x2c   : > { %419 = vperm.xlu1 %1133, %v389_v29  }
  0x2d   : > { %p1137_p1 = pneg %p1136_p0 }
  0x2e   : > { %1027 = vmatmul.mubr.msk.f32.vlgmr.msra.gmra.mrb[0].mxu0 %vm432_vm0, %v368_v27 }
  0x2f   : > { %527 = vmatprep.mubr.f32.mxu0 %v1198_v8  ;;  %424 = vperm.xlu0 %1132, %v390_v28   ;;  %p1144_p5 = pnand %p1143_p4, %p1137_p1 }
  0x30   : > { %429 = vperm.xlu1 %1133, %v391_v32  }
  0x32   : > { %1028 = vmatmul.mubr.msk.f32.gmra.mrb[2].mxu0 %vm432_vm0, %v369_v30 }
  0x33   : > { %533 = vmatprep.mubr.f32.mxu0 %v1198_v8  ;;  %596 = vperm.xlu0 %1132, %v590_v31  }
  0x34   : > { %601 = vperm.xlu1 %1133, %v591_v35  }
  0x36   : > { %1029 = vmatmul.mubr.msk.f32.gmra.mrb[4].mxu0 %vm432_vm0, %v370_v33 }
  0x37   : > { %539 = vmatprep.mubr.f32.mxu0 %v1198_v8  ;;  %606 = vperm.xlu0 %1132, %v592_v34  }
  0x38   : > { %611 = vperm.xlu1 %1133, %v593_v38  }
  0x3a   : > { %1030 = vmatmul.mubr.msk.f32.gmra.mrb[6].mxu0 %vm432_vm0, %v371_v36 }
  0x3b   : > { %545 = vmatprep.mubr.f32.mxu0 %v1198_v8  ;;  %734 = vperm.xlu0 %1132, %v728_v37  }
  0x3c   : > { %739 = vperm.xlu1 %1133, %v729_v41  }
  0x3e   : > { %1031 = vmatmul.mubr.msk.f32.gmra.mrb[8].mxu0 %vm432_vm0, %v372_v39 }
  0x3f   : > { %551 = vmatprep.mubr.f32.mxu0 %v1198_v8  ;;  %744 = vperm.xlu0 %1132, %v730_v40  }
  0x40   : > { %749 = vperm.xlu1 %1133, %v731_v44  }
  0x42   : > { %1032 = vmatmul.mubr.msk.f32.gmra.mrb[10].mxu0 %vm432_vm0, %v373_v42 }
  0x43   : > { %557 = vmatprep.mubr.f32.mxu0 %v1198_v8  ;;  %867 = vperm.xlu0 %1132, %v861_v43  }
  0x44   : > { %872 = vperm.xlu1 %1133, %v862_v47  }
  0x46   : > { %1033 = vmatmul.mubr.msk.f32.gmra.mrb[12].mxu0 %vm432_vm0, %v374_v45 }
  0x47   : > { %563 = vmatprep.mubr.f32.mxu0 %v1198_v8  ;;  %877 = vperm.xlu0 %1132, %v863_v46  }
  0x48   : > { %882 = vperm.xlu1 %1133, %v864_v49  }
  0x4a   : > { %1034 = vmatmul.mubr.msk.f32.gmra.mrb[14].mxu0 %vm432_vm0, %v375_v48 }
  0x4b   : > { %691 = vmatprep.mubr.f32.mxu0 %v1198_v8 }
  0xa2   : > { %v395_v50 = vpop.permute.xlu0 %394  ;;  %v405_v59 = vpop.permute.xlu1 %404 }
  0xa6   : > { %v400_v54 = vpop.permute.xlu0 %399 }
  0xa7   : > { %v410_v6 = vpop.permute.xlu1 %409 }
  0xaa   : > { %v415_v20 = vpop.permute.xlu0 %414 }
  0xab   : > { %v420_v23 = vpop.permute.xlu1 %419 }
  0xae   : > { %v425_v36 = vpop.permute.xlu0 %424 }
  0xaf   : > { %v430_v39 = vpop.permute.xlu1 %429 }
 0x101   : > { %v523_v51 = vpop.f32.mrb[0].mxu0 }
 0x102   : > { %v525_v52 = vpop.f32.mrb[1].mxu0  ;;  %v524_v53 = vadd.f32 %v523_v51, %v395_v50  ;;  %v586_v51 = vld [vmem:[%s1504_s3] sm:$0xff] }
 0x103   : > { %v526_v55 = vadd.f32 %v525_v52, %v395_v50  ;;  %v587_v52 = vld [vmem:[%s1504_s3 + $0x8] sm:$0xff] }
 0x104   : > { %v570_v61 = vmax.f32 %v524_v53, 0.0  ;;  %v588_v53 = vld [vmem:[%s1504_s3 + $0x10] sm:$0xff] }
 0x105   : > { %v529_v56 = vpop.f32.mrb[2].mxu0  ;;  %v571_v63 = vmax.f32 %v526_v55, 0.0  ;;  %v597_v55 = vpop.permute.xlu0 %596 }
 0x106   : > { %v530_v57 = vadd.f32 %v529_v56, %v400_v54  ;;  %v531_v58 = vpop.f32.mrb[3].mxu0  ;;  %v602_v56 = vpop.permute.xlu1 %601 }
 0x107   : > { %v532_v60 = vadd.f32 %v531_v58, %v400_v54  ;;  %v589_v54 = vld [vmem:[%s1504_s3 + $0x18] sm:$0xff] }
 0x108   : > { %v572_v62 = vmax.f32 %v530_v57, 0.0 }
 0x109   : > { %v573_v0 = vmax.f32 %v532_v60, 0.0  ;;  %v535_v1 = vpop.f32.mrb[4].mxu0 }
 0x10a   : > { %v1060_v2 = vpack.c.bf16 %v572_v62, %v570_v61  ;;  %v537_v3 = vpop.f32.mrb[5].mxu0  ;;  %v536_v5 = vadd.f32 %v535_v1, %v405_v59 }
 0x10b   : > { %v1058_v4 = vpack.c.bf16 %v573_v0, %v571_v63  ;;  %v538_v7 = vadd.f32 %v537_v3, %v405_v59 }
 0x10c   : > { %v574_v13 = vmax.f32 %v536_v5, 0.0 }
 0x10d   : > { %v541_v9 = vpop.f32.mrb[6].mxu0  ;;  %1059 = vmatprep.subr.bf16.mxu0 %v1058_v4  ;;  %1082 = vmatprep.subr.bf16.mxu1 %v1058_v4  ;;  %v575_v15 = vmax.f32 %v538_v7, 0.0 }
 0x10e   : > { %v542_v10 = vadd.f32 %v541_v9, %v410_v6  ;;  %v543_v11 = vpop.f32.mrb[7].mxu0  ;;  %1061 = vmatpush1.bf16.msra.mxu0 %v1060_v2  ;;  %1086 = vmatpush1.bf16.msra.mxu1 %v1060_v2  ;;  %v607_v9 = vpop.permute.xlu0 %606 }
 0x10f   : > { %v544_v12 = vadd.f32 %v543_v11, %v410_v6 }
 0x110   : > { %v576_v14 = vmax.f32 %v542_v10, 0.0 }
 0x111   : > { %v577_v16 = vmax.f32 %v544_v12, 0.0  ;;  %v547_v17 = vpop.f32.mrb[8].mxu0  ;;  %v612_v12 = vpop.permute.xlu1 %611 }
 0x112   : > { %v1064_v18 = vpack.c.bf16 %v576_v14, %v574_v13  ;;  %v549_v19 = vpop.f32.mrb[9].mxu0  ;;  %v548_v22 = vadd.f32 %v547_v17, %v415_v20 }
 0x113   : > { %v1062_v21 = vpack.c.bf16 %v577_v16, %v575_v15  ;;  %v550_v24 = vadd.f32 %v549_v19, %v415_v20 }
 0x114   : > { %v578_v29 = vmax.f32 %v548_v22, 0.0 }
 0x115   : > { %v553_v25 = vpop.f32.mrb[10].mxu0  ;;  %1063 = vmatprep.subr.bf16.mxu0 %v1062_v21  ;;  %1083 = vmatprep.subr.bf16.mxu1 %v1062_v21  ;;  %v579_v31 = vmax.f32 %v550_v24, 0.0  ;;  %v724_v24 = vld [vmem:[%s1506_s5] sm:$0xff] }
 0x116   : > { %v554_v26 = vadd.f32 %v553_v25, %v420_v23  ;;  %v555_v27 = vpop.f32.mrb[11].mxu0  ;;  %1065 = vmatpush1.bf16.msra.mxu0 %v1064_v18  ;;  %1087 = vmatpush1.bf16.msra.mxu1 %v1064_v18  ;;  %v725_v25 = vld [vmem:[%s1506_s5 + $0x8] sm:$0xff] }
 0x117   : > { %v556_v28 = vadd.f32 %v555_v27, %v420_v23  ;;  %v727_v27 = vld [vmem:[%s1506_s5 + $0x18] sm:$0xff] }
 0x118   : > { %v580_v30 = vmax.f32 %v554_v26, 0.0  ;;  %v726_v26 = vld [vmem:[%s1506_s5 + $0x10] sm:$0xff] }
 0x119   : > { %v581_v32 = vmax.f32 %v556_v28, 0.0  ;;  %v559_v33 = vpop.f32.mrb[12].mxu0  ;;  %v735_v28 = vpop.permute.xlu0 %734 }
 0x11a   : > { %v1068_v34 = vpack.c.bf16 %v580_v30, %v578_v29  ;;  %v561_v35 = vpop.f32.mrb[13].mxu0  ;;  %v560_v38 = vadd.f32 %v559_v33, %v425_v36  ;;  %v740_v29 = vpop.permute.xlu1 %739 }
 0x11b   : > { %v1066_v37 = vpack.c.bf16 %v581_v32, %v579_v31  ;;  %v562_v40 = vadd.f32 %v561_v35, %v425_v36 }
 0x11c   : > { %v582_v45 = vmax.f32 %v560_v38, 0.0 }
 0x11d   : > { %v565_v41 = vpop.f32.mrb[14].mxu0  ;;  %1067 = vmatprep.subr.bf16.mxu0 %v1066_v37  ;;  %1084 = vmatprep.subr.bf16.mxu1 %v1066_v37  ;;  %v583_v47 = vmax.f32 %v562_v40, 0.0  ;;  %v745_v30 = vpop.permute.xlu0 %744 }
 0x11e   : > { %v566_v42 = vadd.f32 %v565_v41, %v430_v39  ;;  %v567_v43 = vpop.f32.mrb[15].mxu0  ;;  %1069 = vmatpush1.bf16.msra.mxu0 %v1068_v34  ;;  %1088 = vmatpush1.bf16.msra.mxu1 %v1068_v34  ;;  %v750_v34 = vpop.permute.xlu1 %749 }
 0x11f   : > { %v568_v44 = vadd.f32 %v567_v43, %v430_v39 }
 0x120   : > { %v584_v46 = vmax.f32 %v566_v42, 0.0 }
 0x121   : > { %v585_v48 = vmax.f32 %v568_v44, 0.0  ;;  %v868_v40 = vpop.permute.xlu0 %867 }
 0x122   : > { %v1072_v49 = vpack.c.bf16 %v584_v46, %v582_v45  ;;  %v873_v43 = vpop.permute.xlu1 %872 }
 0x123   : > { %v1070_v50 = vpack.c.bf16 %v585_v48, %v583_v47 }
 0x125   : > { %1071 = vmatprep.subr.bf16.mxu0 %v1070_v50  ;;  %1085 = vmatprep.subr.bf16.mxu1 %v1070_v50 }
 0x126   : > { %1073 = vmatpush1.bf16.msra.mxu0 %v1072_v49  ;;  %1089 = vmatpush1.bf16.msra.mxu1 %v1072_v49 }
 0x129   : > { %1035 = vmatmul.mubr.msk.f32.vlgmr.msra.gmra.mrb[16].mxu0 %vm614_vm1, %v586_v51  ;;  %1036 = vmatmul.mubr.msk.f32.vlgmr.msra.gmra.mrb[0].mxu1 %vm614_vm1, %v587_v52 }
 0x12a   : > { %703 = vmatprep.mubr.f32.mxu1 %v1198_v8 }
 0x12d   : > { %1037 = vmatmul.mubr.msk.f32.gmra.mrb[2].mxu1 %vm614_vm1, %v588_v53 }
 0x12e   : > { %709 = vmatprep.mubr.f32.mxu1 %v1198_v8 }
 0x131   : > { %1038 = vmatmul.mubr.msk.f32.gmra.mrb[4].mxu1 %vm614_vm1, %v589_v54 }
 0x132   : > { %828 = vmatprep.mubr.f32.mxu1 %v1198_v8 }
 0x1fc   : > { %v693_v57 = vpop.f32.mrb[16].mxu0  ;;  %v699_v58 = vpop.f32.mrb[0].mxu1 }
 0x1fd   : > { %v694_v59 = vadd.f32 %v693_v57, %v597_v55  ;;  %v700_v60 = vadd.f32 %v699_v58, %v602_v56  ;;  %v695_v61 = vpop.f32.mrb[17].mxu0  ;;  %v701_v62 = vpop.f32.mrb[1].mxu1 }
 0x1fe   : > { %v696_v63 = vadd.f32 %v695_v61, %v597_v55  ;;  %v702_v0 = vadd.f32 %v701_v62, %v602_v56  ;;  %v878_v55 = vpop.permute.xlu0 %877 }
 0x1ff   : > { %v716_v1 = vmax.f32 %v694_v59, 0.0  ;;  %v718_v2 = vmax.f32 %v700_v60, 0.0 }
 0x200   : > { %v717_v3 = vmax.f32 %v696_v63, 0.0  ;;  %v719_v4 = vmax.f32 %v702_v0, 0.0  ;;  %v705_v5 = vpop.f32.mrb[2].mxu1 }
 0x201   : > { %v1076_v6 = vpack.c.bf16 %v718_v2, %v716_v1  ;;  %v707_v7 = vpop.f32.mrb[3].mxu1  ;;  %v706_v11 = vadd.f32 %v705_v5, %v607_v9  ;;  %v883_v2 = vpop.permute.xlu1 %882 }
 0x202   : > { %v1074_v10 = vpack.c.bf16 %v719_v4, %v717_v3  ;;  %v708_v13 = vadd.f32 %v707_v7, %v607_v9 }
 0x203   : > { %v720_v18 = vmax.f32 %v706_v11, 0.0 }
 0x204   : > { %v711_v14 = vpop.f32.mrb[4].mxu1  ;;  %1075 = vmatprep.subr.bf16.mxu1 %v1074_v10  ;;  %v721_v20 = vmax.f32 %v708_v13, 0.0 }
 0x205   : > { %v712_v15 = vadd.f32 %v711_v14, %v612_v12  ;;  %v713_v16 = vpop.f32.mrb[5].mxu1  ;;  %1077 = vmatpush1.bf16.msra.mxu1 %v1076_v6 }
 0x206   : > { %v714_v17 = vadd.f32 %v713_v16, %v612_v12  ;;  %v1200_v16 = vmov 1966171168  }
 0x207   : > { %v722_v19 = vmax.f32 %v712_v15, 0.0 }
 0x208   : > { %v723_v21 = vmax.f32 %v714_v17, 0.0  ;;  %v919_v17 = vunpack.c.l.s4 %v1200_v16 }
 0x209   : > { %v1080_v22 = vpack.c.bf16 %v722_v19, %v720_v18  ;;  %v921_v18 = vlaneseq }
 0x20a   : > { %v1078_v23 = vpack.c.bf16 %v723_v21, %v721_v20 }
 0x20b   : > { %vm935_vm2 = vcmp.lt.s32.totalorder %v921_v18, 256 }
 0x20c   : > { %1079 = vmatprep.subr.bf16.mxu1 %v1078_v23 }
 0x20d   : > { %1081 = vmatpush1.bf16.msra.mxu1 %v1080_v22  ;;  %v912_v22 = vstv %s911_s15 }
 0x210   : > { %1039 = vmatmul.mubr.msk.f32.vlgmr.msra.gmra.mrb[6].mxu1 %vm432_vm0, %v724_v24  ;;  %v920_v24 = vunpack.c.0.s8 %v919_v17 }
 0x211   : > { %834 = vmatprep.mubr.f32.mxu1 %v1198_v8 }
 0x214   : > { %1040 = vmatmul.mubr.msk.f32.gmra.mrb[8].mxu1 %vm432_vm0, %v725_v25  ;;  %v922_v25 = vshrl.u32 %v921_v18, 7 }
 0x215   : > { %840 = vmatprep.mubr.f32.mxu1 %v1198_v8 }
 0x218   : > { %1041 = vmatmul.mubr.msk.f32.gmra.mrb[10].mxu1 %vm432_vm0, %v726_v26 }
 0x219   : > { %846 = vmatprep.mubr.f32.mxu1 %v1198_v8 }
 0x21c   : > { %1042 = vmatmul.mubr.msk.f32.gmra.mrb[12].mxu1 %vm432_vm0, %v727_v27 }
 0x2e3   : > { %v830_v31 = vpop.f32.mrb[6].mxu1 }
 0x2e4   : > { %v831_v32 = vadd.f32 %v830_v31, %v735_v28  ;;  %v832_v33 = vpop.f32.mrb[7].mxu1 }
 0x2e5   : > { %v833_v35 = vadd.f32 %v832_v33, %v735_v28 }
 0x2e6   : > { %v853_v37 = vmax.f32 %v831_v32, 0.0 }
 0x2e7   : > { %v836_v36 = vpop.f32.mrb[8].mxu1  ;;  %v854_v8 = vmax.f32 %v833_v35, 0.0 }
 0x2e8   : > { %v837_v38 = vadd.f32 %v836_v36, %v740_v29  ;;  %v838_v39 = vpop.f32.mrb[9].mxu1  ;;  %v885_v46 = vmul.f32 %v868_v40, %v853_v37 }
 0x2e9   : > { %v839_v41 = vadd.f32 %v838_v39, %v740_v29  ;;  %v886_v50 = vmul.f32 %v868_v40, %v854_v8 }
 0x2ea   : > { %v855_v42 = vmax.f32 %v837_v38, 0.0 }
 0x2eb   : > { %v856_v44 = vmax.f32 %v839_v41, 0.0  ;;  %v842_v45 = vpop.f32.mrb[10].mxu1 }
 0x2ec   : > { %v887_v47 = vmul.f32 %v873_v43, %v855_v42  ;;  %v843_v48 = vadd.f32 %v842_v45, %v745_v30  ;;  %v844_v49 = vpop.f32.mrb[11].mxu1 }
 0x2ed   : > { %v888_v51 = vmul.f32 %v873_v43, %v856_v44  ;;  %v845_v52 = vadd.f32 %v844_v49, %v745_v30  ;;  %v923_v30 = vsub.s32 %v920_v24, %v922_v25 }
 0x2ee   : > { %v893_v53 = vadd.f32 %v887_v47, %v885_v46  ;;  %v857_v54 = vmax.f32 %v843_v48, 0.0 }
 0x2ef   : > { %v902_v56 = vadd.f32 %v888_v51, %v886_v50  ;;  %v858_v57 = vmax.f32 %v845_v52, 0.0  ;;  %v848_v58 = vpop.f32.mrb[12].mxu1 }
 0x2f0   : > { %v889_v59 = vmul.f32 %v878_v55, %v857_v54  ;;  %v849_v60 = vadd.f32 %v848_v58, %v750_v34  ;;  %v850_v61 = vpop.f32.mrb[13].mxu1 }
 0x2f1   : > { %v890_v62 = vmul.f32 %v878_v55, %v858_v57  ;;  %v851_v63 = vadd.f32 %v850_v61, %v750_v34 }
 0x2f2   : > { %v894_v0 = vadd.f32 %v893_v53, %v889_v59  ;;  %v859_v1 = vmax.f32 %v849_v60, 0.0 }
 0x2f3   : > { %v903_v3 = vadd.f32 %v902_v56, %v890_v62  ;;  %v860_v4 = vmax.f32 %v851_v63, 0.0 }
 0x2f4   : > { %v891_v5 = vmul.f32 %v883_v2, %v859_v1 }
 0x2f5   : > { %v892_v6 = vmul.f32 %v883_v2, %v860_v4 }
 0x2f6   : > { %v895_v7 = vadd.f32 %v894_v0, %v891_v5 }
 0x2f7   : > { %v904_v9 = vadd.f32 %v903_v3, %v892_v6 }
 0x2f8   : > { %v896_v10 = vrot.slane %v895_v7, 4 }
 0x2f9   : > { %v905_v11 = vrot.slane %v904_v9, 4 }
 0x2fa   : > { %v897_v12 = vadd.f32 %v896_v10, %v895_v7 }
 0x2fb   : > { %v906_v13 = vadd.f32 %v905_v11, %v904_v9 }
 0x2fc   : > { %v898_v14 = vrot.slane %v897_v12, 2 }
 0x2fd   : > { %v907_v15 = vrot.slane %v906_v13, 2 }
 0x2fe   : > { %v899_v19 = vadd.f32 %v898_v14, %v897_v12 }
 0x2ff   : > { %v908_v20 = vadd.f32 %v907_v15, %v906_v13 }
 0x300   : > { %v900_v21 = vrot.slane %v899_v19, 1 }
 0x301   : > { %v909_v23 = vrot.slane %v908_v20, 1 }
 0x302   : > { %v901_v26 = vadd.f32 %v900_v21, %v899_v19 }
 0x303   : > { %v910_v27 = vadd.f32 %v909_v23, %v908_v20 }
 0x304   : > { %v913_v28 = vadd.f32 %v912_v22, %v901_v26 }
 0x305   : > { %v914_v29 = vadd.f32 %v912_v22, %v910_v27 }
 0x307   : > { %v917_v31 = vcombine.low %v913_v28, %v914_v29 }
 0x309   : > { %v924_v32 = vrot.slane %v917_v31, %v923_v30 }
 0x30b   : > { %v931_v33 = vrot.slane %v924_v32, %v923_v30 }
 0x30d   : > { %937 = vst.msk [vmem:[%s365_s22] sm:$0x3] %vm935_vm2, %v931_v33 }
 0x30e   : > { %1147 = shalt.err (!%p1144_p5)
}
 0x30f   : > { %s1148_s29 = scalar_lea.hbm %s1457_s26, 32  ;;  %s1152_s18 = scalar_lea.hbm %s1510_s9, 64 }
 0x310   : > { %p1149_p7 = scmp.ne.s32.totalorder %s1457_s26, %s1148_s29  ;;  %p1153_p12 = scmp.lt.u32.totalorder %s1457_s26, %s1510_s9 }
 0x311   : > { %p1154_p13 = scmp.lt.u32.totalorder %s1152_s18, %s1148_s29  ;;  %p1156_p1 = scmp.lt.u32.totalorder %s1148_s29, %s1457_s26 }
 0x312   : > { %p1150_p10 = pnand %p1149_p7, %p1293_p6 }
 0x313   : > { %p1155_p0 = por %p1154_p13, %p1153_p12 }
 0x314   : > { %p1151_p11 = pneg %p1150_p10 }
 0x315   : > { %p1157_p2 = por %p1156_p1, %p1155_p0 }
 0x317   : > { %p1158_p3 = pnand %p1157_p2, %p1151_p11 }
 0x319   : > { %1161 = shalt.err (!%p1158_p3)
}
 0x31a   : > { %1090 = dma.vmem_to_hbm [thread:$0]  (%p1293_p6), %s1459_s23, 32, %s1457_s26, %s939_s27  }
 0x31b PF: > { %s965_s25 = sand.u32 1, %s1184_s11   ;;  %p1093_p4 = pnand %p1020_p9, %p1297_p8 }
 0x31c   : > { %s966_s28 = scalar_lea.sflag [#allocation5], %s965_s25 }
 0x31d   : > { %1179 = dma.done.wait (!%p1093_p4), %s966_s28, 32  }
 0x31e   : > { %1181 = vsyncadd (!%p1093_p4), %s966_s28, 4294967264  ;;  %p20_p5 = scmp.ge.s32.totalorder %s1278_s16, 4   ;;  %s1513_s11 = smov %s1188_s12 }
 0x31f   : > { %s1514_s12 = smov %s1192_s13  ;;  %s1515_s13 = smov %s1291_s19 }
 0x320   : > { %s1516_s14 = smov %s1278_s16  ;;  %22 = sbr.rel (!%p20_p5) target bundleno = 5 (0x5), region = 119 }
 0x327   :  { %971 = vsyncpa [#allocation5], 1 }
 0x328   :  { %973 = vsyncpa [#allocation5 + $0x1], 1 }

</bundles_post_ra>
